<compile_context>
chip_gen: v5e
topology: v5e:2x2
jax: 0.10.0
libtpu: 0.0.40
codegen_flags: <defaults>
</compile_context>

<pallas_src>
import functools

import jax
import jax.numpy as jnp
from jax.experimental import pallas as pl
from jax.experimental.pallas import tpu as pltpu


def attention_kernel(x_ref, wqkv_t_ref, bqkv_ref, wproj_t_ref, bproj_ref, o_ref,
                     *, num_heads, head_dim, num_tokens):
    """Processes a block of whole samples; rows = samples_in_block * num_tokens.

    Weights arrive pre-transposed (contraction-major) with the softmax scale already
    folded into the Q columns, so the kernel issues only plain `A @ B` matmuls and
    never materializes a lane-axis head concatenation.
    """
    rows, dim = x_ref.shape
    H, hd, N = num_heads, head_dim, num_tokens
    bb = rows // N                                        # samples in this block

    x = x_ref[...]                                        # (rows, D)
    wqkv_t = wqkv_t_ref[...]                              # (D, 3D)   Q cols pre-scaled
    bqkv = bqkv_ref[...]                                  # (1, 3D)   Q part pre-scaled
    wproj_t = wproj_t_ref[...]                            # (D, D)
    bproj = bproj_ref[...]                                # (1, D)

    # Fused QKV projection for every token in the block (f32 MXU accumulation).
    qkv = jnp.dot(x, wqkv_t, preferred_element_type=jnp.float32) + bqkv   # (rows, 3D)

    # Per-head attention, batched over all samples in the block via leading-batch einsums.
    acc = jnp.zeros((rows, dim), dtype=jnp.float32)
    for h in range(H):                                    # H is small & static -> fully unrolled
        q_h = qkv[:, 0 * dim + h * hd:0 * dim + (h + 1) * hd].reshape(bb, N, hd)
        k_h = qkv[:, 1 * dim + h * hd:1 * dim + (h + 1) * hd].reshape(bb, N, hd)
        v_h = qkv[:, 2 * dim + h * hd:2 * dim + (h + 1) * hd].reshape(bb, N, hd)

        # Scale is already folded into q_h via the pre-scaled Q weights/bias.
        s = jnp.einsum('bqd,bkd->bqk', q_h, k_h,
                       preferred_element_type=jnp.float32)            # (bb, N, N)
        m = jnp.max(s, axis=-1, keepdims=True)
        p = jnp.exp(s - m)
        l = jnp.sum(p, axis=-1, keepdims=True)
        attn = p * pl.reciprocal(l, approx=False)                      # softmax
        # TODO(synk): attention_dropout omitted (identity in eval mode).

        wa = jnp.einsum('bqk,bkd->bqd', attn, v_h,
                        preferred_element_type=jnp.float32)            # (bb, N, hd)

        # concat-over-heads + projection == sum_h wa_h @ Wp^T[h*hd:(h+1)*hd, :]
        acc = acc + jnp.dot(wa.reshape(rows, hd),
                            wproj_t[h * hd:(h + 1) * hd, :],
                            preferred_element_type=jnp.float32)

    out = acc + bproj                                                  # (rows, D)
    # TODO(synk): projection_dropout omitted (identity in eval mode).
    o_ref[...] = out.astype(o_ref.dtype)


def attention_forward(x, w_qkv, b_qkv, w_proj, b_proj, *, num_heads, block_b=None):
    """Multi-head self-attention forward (eval mode) as a Pallas TPU kernel.

    w_qkv: (3D, D) PyTorch Linear layout; b_qkv: (1, 3D); w_proj: (D, D); b_proj: (1, D).
    """
    B, N, D = x.shape
    head_dim = D // num_heads
    scale = head_dim ** -0.5

    # Fold the whole batch into one grid step by default (kernel is step-overhead
    # bound at these sizes). On v7x pass block_b = B // 2 so the 2-step "parallel"
    # grid feeds both TensorCores.
    if block_b is None:
        block_b = B
    assert B % block_b == 0, "block_b must divide the batch"
    grid_b = B // block_b

    # Host/XLA-side prep (runs once, outside the kernel):
    #  * fold the softmax scale into the Q rows of the QKV projection,
    #  * pre-transpose both weights so the kernel does contraction-major matmuls,
    #  * flatten (B, N, D) -> (B*N, D) so loads/stores are plain dense 2-D blocks.
    #    (At D=32 the lane width is the full feature dim; for larger D keep it a
    #     multiple of 128 for unmasked stores.)
    scale_vec = jnp.concatenate(
        [jnp.full((D,), scale, dtype=w_qkv.dtype),
         jnp.ones((2 * D,), dtype=w_qkv.dtype)])
    wqkv_t = jnp.transpose(w_qkv * scale_vec[:, None])                 # (D, 3D)
    bqkv_s = b_qkv * scale_vec[None, :]                                # (1, 3D)
    wproj_t = jnp.transpose(w_proj)                                    # (D, D)
    x2 = x.reshape(B * N, D)

    kernel = functools.partial(attention_kernel,
                               num_heads=num_heads,
                               head_dim=head_dim,
                               num_tokens=N)

    out2 = pl.pallas_call(
        kernel,
        out_shape=jax.ShapeDtypeStruct((B * N, D), x.dtype),
        grid_spec=pltpu.PrefetchScalarGridSpec(
            num_scalar_prefetch=0,
            grid=(grid_b,),
            in_specs=[
                pl.BlockSpec((block_b * N, D), lambda b: (b, 0)),      # token rows
                pl.BlockSpec((D, 3 * D), lambda b: (0, 0)),            # qkv weight^T (resident)
                pl.BlockSpec((1, 3 * D), lambda b: (0, 0)),            # qkv bias (Q pre-scaled)
                pl.BlockSpec((D, D), lambda b: (0, 0)),                # proj weight^T (resident)
                pl.BlockSpec((1, D), lambda b: (0, 0)),                # proj bias
            ],
            out_specs=pl.BlockSpec((block_b * N, D), lambda b: (b, 0)),
        ),
        compiler_params=pltpu.CompilerParams(
            dimension_semantics=("parallel",)),
    )(x2, wqkv_t, bqkv_s, wproj_t, b_proj)

    return out2.reshape(B, N, D)


def reference_forward(x, w_qkv, b_qkv, w_proj, b_proj, *, num_heads):
    """Plain-JAX reference mirroring the PyTorch forward (eval mode)."""
    B, N, D = x.shape
    hd = D // num_heads
    scale = hd ** -0.5
    qkv = jnp.einsum("bnd,ed->bne", x, w_qkv) + b_qkv[0]
    qkv = qkv.reshape(B, N, 3, num_heads, hd).transpose(2, 0, 3, 1, 4)
    q, k, v = qkv[0], qkv[1], qkv[2]                                   # (B, H, N, hd)
    scores = jnp.einsum("bhqd,bhkd->bhqk", q, k) * scale
    attn = jax.nn.softmax(scores, axis=-1)
    wa = jnp.einsum("bhqk,bhkd->bhqd", attn, v)                        # (B, H, N, hd)
    wa = wa.transpose(0, 2, 1, 3).reshape(B, N, D)
    return jnp.einsum("bnd,ed->bne", wa, w_proj) + b_proj[0]


if __name__ == "__main__":
    # Small shapes consistent with the module: dim=32, num_heads=4, include_bias=True.
    B, N, D = 2, 8, 32
    num_heads = 4

    key = jax.random.PRNGKey(0)
    kx, kw1, kb1, kw2, kb2 = jax.random.split(key, 5)

    x = jax.random.normal(kx, (B, N, D), dtype=jnp.float32)
    # Deterministic parameter init (PyTorch Linear layout: weight is (out, in)).
    w_qkv = jax.random.normal(kw1, (3 * D, D), dtype=jnp.float32) * 0.05
    b_qkv = jax.random.normal(kb1, (1, 3 * D), dtype=jnp.float32) * 0.05
    w_proj = jax.random.normal(kw2, (D, D), dtype=jnp.float32) * 0.05
    b_proj = jax.random.normal(kb2, (1, D), dtype=jnp.float32) * 0.05

    out = attention_forward(x, w_qkv, b_qkv, w_proj, b_proj, num_heads=num_heads)
    out = jax.block_until_ready(out)

    ref = reference_forward(x, w_qkv, b_qkv, w_proj, b_proj, num_heads=num_heads)
    assert out.shape == (B, N, D)
    assert jnp.allclose(out, ref, atol=1e-4, rtol=1e-4), "mismatch vs reference"

    print("KERNEL_OK")
</pallas_src>

<mosaic_0001>
module attributes {stable_mosaic.version = 11 : i64} {
  func.func @attention_kernel(%arg0: i32, %arg1: memref<16x32xf32, #tpu.memory_space<vmem>>, %arg2: memref<32x96xf32, #tpu.memory_space<vmem>>, %arg3: memref<1x96xf32, #tpu.memory_space<vmem>>, %arg4: memref<32x32xf32, #tpu.memory_space<vmem>>, %arg5: memref<1x32xf32, #tpu.memory_space<vmem>>, %arg6: memref<16x32xf32, #tpu.memory_space<vmem>>) attributes {dimension_semantics = [#tpu.dimension_semantics<parallel>], iteration_bounds = array<i64: 1>, scalar_prefetch = 0 : i64, scratch_operands = 0 : i64, tpu.core_type = #tpu.core_type<tc>, window_params = [{transform_indices = @transform_0, window_bounds = array<i64: 16, 32>}, {pipeline_mode = #tpu.pipeline_mode<synchronous>, transform_indices = @transform_1, window_bounds = array<i64: 32, 96>}, {pipeline_mode = #tpu.pipeline_mode<synchronous>, transform_indices = @transform_2, window_bounds = array<i64: 1, 96>}, {pipeline_mode = #tpu.pipeline_mode<synchronous>, transform_indices = @transform_3, window_bounds = array<i64: 32, 32>}, {pipeline_mode = #tpu.pipeline_mode<synchronous>, transform_indices = @transform_4, window_bounds = array<i64: 1, 32>}, {transform_indices = @transform_5, window_bounds = array<i64: 16, 32>}]} {
    %c0 = arith.constant 0 : index
    %c0_0 = arith.constant 0 : index
    %0 = vector.load %arg1[%c0, %c0_0] : memref<16x32xf32, #tpu.memory_space<vmem>>, vector<16x32xf32>
    %c0_1 = arith.constant 0 : index
    %c0_2 = arith.constant 0 : index
    %1 = vector.load %arg2[%c0_1, %c0_2] : memref<32x96xf32, #tpu.memory_space<vmem>>, vector<32x96xf32>
    %c0_3 = arith.constant 0 : index
    %c0_4 = arith.constant 0 : index
    %2 = vector.load %arg3[%c0_3, %c0_4] : memref<1x96xf32, #tpu.memory_space<vmem>>, vector<1x96xf32>
    %c0_5 = arith.constant 0 : index
    %c0_6 = arith.constant 0 : index
    %3 = vector.load %arg4[%c0_5, %c0_6] : memref<32x32xf32, #tpu.memory_space<vmem>>, vector<32x32xf32>
    %c0_7 = arith.constant 0 : index
    %c0_8 = arith.constant 0 : index
    %4 = vector.load %arg5[%c0_7, %c0_8] : memref<1x32xf32, #tpu.memory_space<vmem>>, vector<1x32xf32>
    %cst = arith.constant dense<0.000000e+00> : vector<16x96xf32>
    %5 = tpu.matmul %0, %1, %cst {dimension_numbers = #tpu.dot_dimension_numbers<[1], [0], [0], [1], [0, 0, 1, 1], [], []>} : vector<16x32xf32>, vector<32x96xf32>, vector<16x96xf32> -> vector<16x96xf32>
    %6 = vector.broadcast %2 : vector<1x96xf32> to vector<16x96xf32>
    %7 = arith.addf %5, %6 : vector<16x96xf32>
    %cst_9 = arith.constant 0.000000e+00 : f32
    %8 = vector.broadcast %cst_9 : f32 to vector<16x32xf32>
    %9 = vector.extract_strided_slice %7 {offsets = [0, 0], sizes = [16, 8], strides = [1, 1]} : vector<16x96xf32> to vector<16x8xf32>
    %10 = vector.shape_cast %9 : vector<16x8xf32> to vector<2x8x8xf32>
    %11 = vector.extract_strided_slice %7 {offsets = [0, 32], sizes = [16, 8], strides = [1, 1]} : vector<16x96xf32> to vector<16x8xf32>
    %12 = vector.shape_cast %11 : vector<16x8xf32> to vector<2x8x8xf32>
    %13 = vector.extract_strided_slice %7 {offsets = [0, 64], sizes = [16, 8], strides = [1, 1]} : vector<16x96xf32> to vector<16x8xf32>
    %14 = vector.shape_cast %13 : vector<16x8xf32> to vector<2x8x8xf32>
    "tpu.trace_start"() <{level = 10 : i32, message = "bqd,bkd->bqk"}> : () -> ()
    %cst_10 = arith.constant dense<0.000000e+00> : vector<2x8x8xf32>
    %15 = tpu.matmul %10, %12, %cst_10 {dimension_numbers = #tpu.dot_dimension_numbers<[2], [2], [1], [1], [0, 0, 0, 1, 1, 1], [0], [0]>} : vector<2x8x8xf32>, vector<2x8x8xf32>, vector<2x8x8xf32> -> vector<2x8x8xf32>
    "tpu.trace_stop"() : () -> ()
    %cst_11 = arith.constant dense<0xFF800000> : vector<2x8xf32>
    %16 = vector.multi_reduction <maximumf>, %15, %cst_11 [2] : vector<2x8x8xf32> to vector<2x8xf32>
    %17 = vector.shape_cast %16 : vector<2x8xf32> to vector<2x8x1xf32>
    %18 = vector.broadcast %17 : vector<2x8x1xf32> to vector<2x8x8xf32>
    %19 = arith.subf %15, %18 : vector<2x8x8xf32>
    %20 = math.exp %19 : vector<2x8x8xf32>
    %cst_12 = arith.constant dense<0.000000e+00> : vector<2x8xf32>
    %21 = vector.multi_reduction <add>, %20, %cst_12 [2] : vector<2x8x8xf32> to vector<2x8xf32>
    %22 = vector.shape_cast %21 : vector<2x8xf32> to vector<2x8x1xf32>
    %23 = tpu.reciprocal %22 : vector<2x8x1xf32> -> vector<2x8x1xf32>
    %24 = vector.broadcast %23 : vector<2x8x1xf32> to vector<2x8x8xf32>
    %25 = arith.mulf %20, %24 : vector<2x8x8xf32>
    "tpu.trace_start"() <{level = 10 : i32, message = "bqk,bkd->bqd"}> : () -> ()
    %cst_13 = arith.constant dense<0.000000e+00> : vector<2x8x8xf32>
    %26 = tpu.matmul %25, %14, %cst_13 {dimension_numbers = #tpu.dot_dimension_numbers<[2], [1], [1], [2], [0, 0, 0, 1, 1, 2], [0], [0]>} : vector<2x8x8xf32>, vector<2x8x8xf32>, vector<2x8x8xf32> -> vector<2x8x8xf32>
    "tpu.trace_stop"() : () -> ()
    %27 = vector.shape_cast %26 : vector<2x8x8xf32> to vector<16x8xf32>
    %28 = vector.extract_strided_slice %3 {offsets = [0, 0], sizes = [8, 32], strides = [1, 1]} : vector<32x32xf32> to vector<8x32xf32>
    %cst_14 = arith.constant dense<0.000000e+00> : vector<16x32xf32>
    %29 = tpu.matmul %27, %28, %cst_14 {dimension_numbers = #tpu.dot_dimension_numbers<[1], [0], [0], [1], [0, 0, 1, 1], [], []>} : vector<16x8xf32>, vector<8x32xf32>, vector<16x32xf32> -> vector<16x32xf32>
    %30 = arith.addf %8, %29 : vector<16x32xf32>
    %31 = vector.extract_strided_slice %7 {offsets = [0, 8], sizes = [16, 8], strides = [1, 1]} : vector<16x96xf32> to vector<16x8xf32>
    %32 = vector.shape_cast %31 : vector<16x8xf32> to vector<2x8x8xf32>
    %33 = vector.extract_strided_slice %7 {offsets = [0, 40], sizes = [16, 8], strides = [1, 1]} : vector<16x96xf32> to vector<16x8xf32>
    %34 = vector.shape_cast %33 : vector<16x8xf32> to vector<2x8x8xf32>
    %35 = vector.extract_strided_slice %7 {offsets = [0, 72], sizes = [16, 8], strides = [1, 1]} : vector<16x96xf32> to vector<16x8xf32>
    %36 = vector.shape_cast %35 : vector<16x8xf32> to vector<2x8x8xf32>
    "tpu.trace_start"() <{level = 10 : i32, message = "bqd,bkd->bqk"}> : () -> ()
    %cst_15 = arith.constant dense<0.000000e+00> : vector<2x8x8xf32>
    %37 = tpu.matmul %32, %34, %cst_15 {dimension_numbers = #tpu.dot_dimension_numbers<[2], [2], [1], [1], [0, 0, 0, 1, 1, 1], [0], [0]>} : vector<2x8x8xf32>, vector<2x8x8xf32>, vector<2x8x8xf32> -> vector<2x8x8xf32>
    "tpu.trace_stop"() : () -> ()
    %cst_16 = arith.constant dense<0xFF800000> : vector<2x8xf32>
    %38 = vector.multi_reduction <maximumf>, %37, %cst_16 [2] : vector<2x8x8xf32> to vector<2x8xf32>
    %39 = vector.shape_cast %38 : vector<2x8xf32> to vector<2x8x1xf32>
    %40 = vector.broadcast %39 : vector<2x8x1xf32> to vector<2x8x8xf32>
    %41 = arith.subf %37, %40 : vector<2x8x8xf32>
    %42 = math.exp %41 : vector<2x8x8xf32>
    %cst_17 = arith.constant dense<0.000000e+00> : vector<2x8xf32>
    %43 = vector.multi_reduction <add>, %42, %cst_17 [2] : vector<2x8x8xf32> to vector<2x8xf32>
    %44 = vector.shape_cast %43 : vector<2x8xf32> to vector<2x8x1xf32>
    %45 = tpu.reciprocal %44 : vector<2x8x1xf32> -> vector<2x8x1xf32>
    %46 = vector.broadcast %45 : vector<2x8x1xf32> to vector<2x8x8xf32>
    %47 = arith.mulf %42, %46 : vector<2x8x8xf32>
    "tpu.trace_start"() <{level = 10 : i32, message = "bqk,bkd->bqd"}> : () -> ()
    %cst_18 = arith.constant dense<0.000000e+00> : vector<2x8x8xf32>
    %48 = tpu.matmul %47, %36, %cst_18 {dimension_numbers = #tpu.dot_dimension_numbers<[2], [1], [1], [2], [0, 0, 0, 1, 1, 2], [0], [0]>} : vector<2x8x8xf32>, vector<2x8x8xf32>, vector<2x8x8xf32> -> vector<2x8x8xf32>
    "tpu.trace_stop"() : () -> ()
    %49 = vector.shape_cast %48 : vector<2x8x8xf32> to vector<16x8xf32>
    %50 = vector.extract_strided_slice %3 {offsets = [8, 0], sizes = [8, 32], strides = [1, 1]} : vector<32x32xf32> to vector<8x32xf32>
    %cst_19 = arith.constant dense<0.000000e+00> : vector<16x32xf32>
    %51 = tpu.matmul %49, %50, %cst_19 {dimension_numbers = #tpu.dot_dimension_numbers<[1], [0], [0], [1], [0, 0, 1, 1], [], []>} : vector<16x8xf32>, vector<8x32xf32>, vector<16x32xf32> -> vector<16x32xf32>
    %52 = arith.addf %30, %51 : vector<16x32xf32>
    %53 = vector.extract_strided_slice %7 {offsets = [0, 16], sizes = [16, 8], strides = [1, 1]} : vector<16x96xf32> to vector<16x8xf32>
    %54 = vector.shape_cast %53 : vector<16x8xf32> to vector<2x8x8xf32>
    %55 = vector.extract_strided_slice %7 {offsets = [0, 48], sizes = [16, 8], strides = [1, 1]} : vector<16x96xf32> to vector<16x8xf32>
    %56 = vector.shape_cast %55 : vector<16x8xf32> to vector<2x8x8xf32>
    %57 = vector.extract_strided_slice %7 {offsets = [0, 80], sizes = [16, 8], strides = [1, 1]} : vector<16x96xf32> to vector<16x8xf32>
    %58 = vector.shape_cast %57 : vector<16x8xf32> to vector<2x8x8xf32>
    "tpu.trace_start"() <{level = 10 : i32, message = "bqd,bkd->bqk"}> : () -> ()
    %cst_20 = arith.constant dense<0.000000e+00> : vector<2x8x8xf32>
    %59 = tpu.matmul %54, %56, %cst_20 {dimension_numbers = #tpu.dot_dimension_numbers<[2], [2], [1], [1], [0, 0, 0, 1, 1, 1], [0], [0]>} : vector<2x8x8xf32>, vector<2x8x8xf32>, vector<2x8x8xf32> -> vector<2x8x8xf32>
    "tpu.trace_stop"() : () -> ()
    %cst_21 = arith.constant dense<0xFF800000> : vector<2x8xf32>
    %60 = vector.multi_reduction <maximumf>, %59, %cst_21 [2] : vector<2x8x8xf32> to vector<2x8xf32>
    %61 = vector.shape_cast %60 : vector<2x8xf32> to vector<2x8x1xf32>
    %62 = vector.broadcast %61 : vector<2x8x1xf32> to vector<2x8x8xf32>
    %63 = arith.subf %59, %62 : vector<2x8x8xf32>
    %64 = math.exp %63 : vector<2x8x8xf32>
    %cst_22 = arith.constant dense<0.000000e+00> : vector<2x8xf32>
    %65 = vector.multi_reduction <add>, %64, %cst_22 [2] : vector<2x8x8xf32> to vector<2x8xf32>
    %66 = vector.shape_cast %65 : vector<2x8xf32> to vector<2x8x1xf32>
    %67 = tpu.reciprocal %66 : vector<2x8x1xf32> -> vector<2x8x1xf32>
    %68 = vector.broadcast %67 : vector<2x8x1xf32> to vector<2x8x8xf32>
    %69 = arith.mulf %64, %68 : vector<2x8x8xf32>
    "tpu.trace_start"() <{level = 10 : i32, message = "bqk,bkd->bqd"}> : () -> ()
    %cst_23 = arith.constant dense<0.000000e+00> : vector<2x8x8xf32>
    %70 = tpu.matmul %69, %58, %cst_23 {dimension_numbers = #tpu.dot_dimension_numbers<[2], [1], [1], [2], [0, 0, 0, 1, 1, 2], [0], [0]>} : vector<2x8x8xf32>, vector<2x8x8xf32>, vector<2x8x8xf32> -> vector<2x8x8xf32>
    "tpu.trace_stop"() : () -> ()
    %71 = vector.shape_cast %70 : vector<2x8x8xf32> to vector<16x8xf32>
    %72 = vector.extract_strided_slice %3 {offsets = [16, 0], sizes = [8, 32], strides = [1, 1]} : vector<32x32xf32> to vector<8x32xf32>
    %cst_24 = arith.constant dense<0.000000e+00> : vector<16x32xf32>
    %73 = tpu.matmul %71, %72, %cst_24 {dimension_numbers = #tpu.dot_dimension_numbers<[1], [0], [0], [1], [0, 0, 1, 1], [], []>} : vector<16x8xf32>, vector<8x32xf32>, vector<16x32xf32> -> vector<16x32xf32>
    %74 = arith.addf %52, %73 : vector<16x32xf32>
    %75 = vector.extract_strided_slice %7 {offsets = [0, 24], sizes = [16, 8], strides = [1, 1]} : vector<16x96xf32> to vector<16x8xf32>
    %76 = vector.shape_cast %75 : vector<16x8xf32> to vector<2x8x8xf32>
    %77 = vector.extract_strided_slice %7 {offsets = [0, 56], sizes = [16, 8], strides = [1, 1]} : vector<16x96xf32> to vector<16x8xf32>
    %78 = vector.shape_cast %77 : vector<16x8xf32> to vector<2x8x8xf32>
    %79 = vector.extract_strided_slice %7 {offsets = [0, 88], sizes = [16, 8], strides = [1, 1]} : vector<16x96xf32> to vector<16x8xf32>
    %80 = vector.shape_cast %79 : vector<16x8xf32> to vector<2x8x8xf32>
    "tpu.trace_start"() <{level = 10 : i32, message = "bqd,bkd->bqk"}> : () -> ()
    %cst_25 = arith.constant dense<0.000000e+00> : vector<2x8x8xf32>
    %81 = tpu.matmul %76, %78, %cst_25 {dimension_numbers = #tpu.dot_dimension_numbers<[2], [2], [1], [1], [0, 0, 0, 1, 1, 1], [0], [0]>} : vector<2x8x8xf32>, vector<2x8x8xf32>, vector<2x8x8xf32> -> vector<2x8x8xf32>
    "tpu.trace_stop"() : () -> ()
    %cst_26 = arith.constant dense<0xFF800000> : vector<2x8xf32>
    %82 = vector.multi_reduction <maximumf>, %81, %cst_26 [2] : vector<2x8x8xf32> to vector<2x8xf32>
    %83 = vector.shape_cast %82 : vector<2x8xf32> to vector<2x8x1xf32>
    %84 = vector.broadcast %83 : vector<2x8x1xf32> to vector<2x8x8xf32>
    %85 = arith.subf %81, %84 : vector<2x8x8xf32>
    %86 = math.exp %85 : vector<2x8x8xf32>
    %cst_27 = arith.constant dense<0.000000e+00> : vector<2x8xf32>
    %87 = vector.multi_reduction <add>, %86, %cst_27 [2] : vector<2x8x8xf32> to vector<2x8xf32>
    %88 = vector.shape_cast %87 : vector<2x8xf32> to vector<2x8x1xf32>
    %89 = tpu.reciprocal %88 : vector<2x8x1xf32> -> vector<2x8x1xf32>
    %90 = vector.broadcast %89 : vector<2x8x1xf32> to vector<2x8x8xf32>
    %91 = arith.mulf %86, %90 : vector<2x8x8xf32>
    "tpu.trace_start"() <{level = 10 : i32, message = "bqk,bkd->bqd"}> : () -> ()
    %cst_28 = arith.constant dense<0.000000e+00> : vector<2x8x8xf32>
    %92 = tpu.matmul %91, %80, %cst_28 {dimension_numbers = #tpu.dot_dimension_numbers<[2], [1], [1], [2], [0, 0, 0, 1, 1, 2], [0], [0]>} : vector<2x8x8xf32>, vector<2x8x8xf32>, vector<2x8x8xf32> -> vector<2x8x8xf32>
    "tpu.trace_stop"() : () -> ()
    %93 = vector.shape_cast %92 : vector<2x8x8xf32> to vector<16x8xf32>
    %94 = vector.extract_strided_slice %3 {offsets = [24, 0], sizes = [8, 32], strides = [1, 1]} : vector<32x32xf32> to vector<8x32xf32>
    %cst_29 = arith.constant dense<0.000000e+00> : vector<16x32xf32>
    %95 = tpu.matmul %93, %94, %cst_29 {dimension_numbers = #tpu.dot_dimension_numbers<[1], [0], [0], [1], [0, 0, 1, 1], [], []>} : vector<16x8xf32>, vector<8x32xf32>, vector<16x32xf32> -> vector<16x32xf32>
    %96 = arith.addf %74, %95 : vector<16x32xf32>
    %97 = vector.broadcast %4 : vector<1x32xf32> to vector<16x32xf32>
    %98 = arith.addf %96, %97 : vector<16x32xf32>
    %c0_30 = arith.constant 0 : index
    %c0_31 = arith.constant 0 : index
    %99 = vector.load %arg6[%c0_30, %c0_31] : memref<16x32xf32, #tpu.memory_space<vmem>>, vector<16x32xf32>
    tpu.vector_store %arg6[%c0_30, %c0_31], %98 {strides = array<i32>} : memref<16x32xf32, #tpu.memory_space<vmem>>, vector<16x32xf32>,
    return
  }
  func.func @transform_0(%arg0: i32) -> (i32, i32) {
    %c0_i32 = arith.constant 0 : i32
    %c0_i32_0 = arith.constant 0 : i32
    return %arg0, %c0_i32 : i32, i32
  }
  func.func @transform_1(%arg0: i32) -> (i32, i32) {
    %c0_i32 = arith.constant 0 : i32
    %c0_i32_0 = arith.constant 0 : i32
    %c0_i32_1 = arith.constant 0 : i32
    return %c0_i32, %c0_i32_0 : i32, i32
  }
  func.func @transform_2(%arg0: i32) -> (i32, i32) {
    %c0_i32 = arith.constant 0 : i32
    %c0_i32_0 = arith.constant 0 : i32
    %c0_i32_1 = arith.constant 0 : i32
    return %c0_i32, %c0_i32_0 : i32, i32
  }
  func.func @transform_3(%arg0: i32) -> (i32, i32) {
    %c0_i32 = arith.constant 0 : i32
    %c0_i32_0 = arith.constant 0 : i32
    %c0_i32_1 = arith.constant 0 : i32
    return %c0_i32, %c0_i32_0 : i32, i32
  }
  func.func @transform_4(%arg0: i32) -> (i32, i32) {
    %c0_i32 = arith.constant 0 : i32
    %c0_i32_0 = arith.constant 0 : i32
    %c0_i32_1 = arith.constant 0 : i32
    return %c0_i32, %c0_i32_0 : i32, i32
  }
  func.func @transform_5(%arg0: i32) -> (i32, i32) {
    %c0_i32 = arith.constant 0 : i32
    %c0_i32_0 = arith.constant 0 : i32
    return %arg0, %c0_i32 : i32, i32
  }
}

</mosaic_0001>

<bundles_post_ra>
// kernel: tpu_custom_call.1
= control target key start
LH: loop header
LB: loop body
LE: loop exit
PB: predicated region body
PF: predicated region fallthrough
CT: control target
= control target key end

     0   :  { %10 = vsyncpa [#allocation3], 0  ;;  %s1247_s0 = inlined_call_operand.hbm [shape: f32[16,32], index: 0, kind: input, shape index: {}]   ;;  %s1248_s1 = inlined_call_operand.hbm [shape: f32[32,96], index: 1, kind: input, shape index: {}]   ;;  %s1249_s2 = inlined_call_operand.vmem [shape: f32[1,96], index: 2, kind: input, shape index: {}]   ;;  %s1250_s3 = inlined_call_operand.hbm [shape: f32[32,32], index: 3, kind: input, shape index: {}]   ;;  %s1251_s4 = inlined_call_operand.vmem [shape: f32[1,32], index: 4, kind: input, shape index: {}]   ;;  %s1252_s5 = inlined_call_operand.hbm [shape: f32[16,32], index: 5, kind: output, shape index: {}]  }
   0x1   :  { %11 = vsyncpa [#allocation6], 0 }
   0x2   :  { %12 = vsyncpa [#allocation4], 0  ;;  %s30_s20 = sshll.u32 %s1248_s1, 4  ;;  %s1070_s21 = smov [#allocation5]   ;;  %s31_s20 = int_to_ptr.hbm [resolvable:$true] %s30_s20 }
   0x3   :  { %s32_s22 = sshll.u32 %s1070_s21, 4  ;;  %s17_s25 = sshll.u32 %s1247_s0, 4  ;;  %s33_s22 = int_to_ptr.vmem [resolvable:$true] %s32_s22  ;;  %s18_s25 = int_to_ptr.hbm [resolvable:$true] %s17_s25 }
   0x4   :  { %s1071_s26 = smov 128   ;;  %s1072_s27 = smov 8  }
   0x5   :  { %38 = dma.hbm_to_vmem [thread:$0]  %s31_s20, 512, %s33_s22, [#allocation6], %s1071_s26, %s1071_s26, %s1072_s27  }
   0x6   :  { %s1073_s28 = smov [#allocation2]   ;;  %s45_s1 = sshll.u32 %s1250_s3, 4  ;;  %s46_s1 = int_to_ptr.hbm [resolvable:$true] %s45_s1 }
   0x7   :  { %s19_s29 = sshll.u32 %s1073_s28, 4  ;;  %s1074_s0 = smov [#allocation7]   ;;  %s20_s29 = int_to_ptr.vmem [resolvable:$true] %s19_s29 }
   0x8   :  { %25 = dma.hbm_to_vmem [thread:$0]  %s18_s25, 256, %s20_s29, [#allocation3], %s1071_s26, %s1071_s26, %s1072_s27  }
   0x9   :  { %s47_s7 = sshll.u32 %s1074_s0, 4  ;;  %s48_s7 = int_to_ptr.vmem [resolvable:$true] %s47_s7 }
   0xa   :  { %53 = dma.hbm_to_vmem [thread:$0]  %s46_s1, 512, %s48_s7, [#allocation6], %s1071_s26, %s1071_s26, %s1072_s27  }
   0xb   :  { %1064 = dma.done.wait [#allocation3], 256  }
   0xc   :  { %1065 = vsyncadd [#allocation3], 4294967040 }
   0xd   :  { %1066 = dma.done.wait [#allocation6], 1024  }
   0xe   :  { %1067 = vsyncadd [#allocation6], 4294966272  ;;  %v73_v0 = vld [vmem:[#allocation5 + $0x18] sm:$0xff]  ;;  %v72_v1 = vld [vmem:[#allocation5 + $0x10] sm:$0xff]  ;;  %vm83_vm0 = vcmask 261120   ;;  %s1075_s9 = smov 64  }
   0xf   :  { %102 = vmatpush.msra.mxu0 %v73_v0  ;;  %v71_v2 = vld [vmem:[#allocation5 + $0x8] sm:$0xff]  ;;  %v70_v3 = vld [vmem:[#allocation5] sm:$0xff]  ;;  %v68_v4 = vld [vmem:[#allocation2] sm:$0xff]  ;;  %s1076_s10 = smov 96   ;;  %s1077_s11 = smov 88   ;;  %vm116_vm1 = vcmask 64512  }
  0x10   :  { %v934_v5 = vld [vmem:[%s1249_s2] ss:$0 sm:$0xff]  ;;  %s1078_s12 = smov 120   ;;  %v69_v11 = vld [vmem:[#allocation2 + $0x8] sm:$0xff]  ;;  %v75_v35 = vld [vmem:[#allocation7] sm:$0xff]  ;;  %s1079_s2 = smov 80  }
  0x11   :  { %103 = vmatpush.msra.mxu0 %v72_v1  ;;  %s1080_s13 = smov 56   ;;  %s1081_s14 = smov 112  }
  0x12   :  { %s1082_s15 = smov 72   ;;  %s1083_s16 = smov 104  }
  0x13   :  { %104 = vmatpush.msra.mxu0 %v71_v2  ;;  %s1084_s17 = smov 48   ;;  %s1085_s18 = smov 40  }
  0x14   :  { %s1086_s21 = smov [#allocation8]   ;;  %s869_s25 = sshll.u32 %s1252_s5, 4  ;;  %s870_s25 = int_to_ptr.hbm [resolvable:$true] %s869_s25 }
  0x15   :  { %105 = vmatpush.msra.mxu0 %v70_v3  ;;  %s867_s22 = sshll.u32 %s1086_s21, 4  ;;  %s868_s22 = int_to_ptr.vmem [resolvable:$true] %s867_s22 }
  0x16   :  { %883 = vmatmul.msk.f32.vlgmr.msra.gmra.mxu0 %vm83_vm0, %v68_v4 }
  0x17   :  { %474 = vmatpush.msrb.mxu0 %v75_v35 }
  0x1e   :  { %884 = vmatmul.msk.f32.gmra.mxu0 %vm83_vm0, %v69_v11 }
  0x93   :  { %v107_v6 = vpop.f32.mrf.mxu0 }
  0x94   :  { %v1139_v7 = vadd.f32 %v934_v5, %v107_v6 }
  0x96   :  { %216 = vrot.lane.b32.xlu2 %v1139_v7, %s1075_s9  ;;  %114 = vrot.lane.b32.xlu0 %v1139_v7, %s1076_s10 }
  0x9b   :  { %v110_v19 = vpop.f32.mrf.mxu0 }
  0x9c   :  { %v1155_v20 = vadd.f32 %v934_v5, %v110_v19 }
  0x9e   :  { %270 = vrot.lane.b32.xlu2 %v1139_v7, %s1077_s11 }
  0xa6   :  { %268 = vrot.lane.b32.xlu2 %v1139_v7, %s1078_s12 }
  0xf0   :  { %v217_v8 = vpop.permute.xlu2 %216 }
  0xf8   :  { %v271_v10 = vpop.permute.xlu2 %270 }
 0x100   :  { %v269_v34 = vpop.permute.xlu2 %268 }
 0x108   :  { %v115_v9 = vpop.permute.xlu0 %114 }
 0x109   :  { %885 = vmatpush.xpose.msk.msra.mxu1 %vm116_vm1, %v115_v9 }
 0x10c   :  { %886 = vmatmul.msk.f32.vlgmr.msra.gmra.mxu1 %vm116_vm1, %v1139_v7 }
 0x10d   :  { %237 = vmatpush.msrb.mxu1 %v217_v8 }
 0x10f   :  { %891 = vmatpush.xpose.msk.msra.mxu1 %vm116_vm1, %v271_v10 }
 0x189   :  { %v138_v12 = vpop.f32.mrf.mxu1 }
 0x18a   :  { %v168_v13 = vsel %vm116_vm1, %v138_v12, -inf }
 0x18b   :  { %169 = vmax.xlane.f32.xlu0 %v168_v13 }
 0x1fe   :  { %v170_v14 = vpop.xlane.xlu0 %169 }
 0x1ff   :  { %v174_v15 = vsub.f32 %v138_v12, %v170_v14 }
 0x201   :  { %v176_v16 = vmul.f32 1.442695, %v174_v15 }
 0x203   :  { %936 = vpow2.f32 %v176_v16 }
 0x209   :  { %v937_v17 = vpop.eup %936 }
 0x20a   :  { %v180_v18 = vsel %vm116_vm1, %v937_v17, 0.0 }
 0x20b   :  { %181 = vadd.xlane.f32.xlu1 %v180_v18 }
 0x224   :  { %142 = vrot.lane.b32.xlu1 %v1155_v20, %s1076_s10 }
 0x27e   :  { %v182_v21 = vpop.xlane.xlu1 %181 }
 0x27f   :  { %938 = vrcp.f32 %v182_v21  ;;  %v197_v25 = vand.u32 2147483648, %v182_v21  ;;  %v195_v27 = vand.u32 2147483647, %v182_v21  ;;  %vm191_vm3 = vweird.f32 %v182_v21 }
 0x281   :  { %v198_v29 = vor.u32 1.1754944e-38, %v197_v25  ;;  %vm196_vm5 = vcmp.eq.f32.partialorder %v195_v27, 8.507059e+37 }
 0x285   :  { %v939_v22 = vpop.eup %938 }
 0x286   :  { %v187_v23 = vmul.f32 %v939_v22, %v182_v21  ;;  %vm192_vm2 = vweird.f32 %v939_v22 }
 0x287   :  { %vm193_vm4 = vmor %vm191_vm3, %vm192_vm2 }
 0x288   :  { %v188_v24 = vsub.f32 1.0, %v187_v23 }
 0x28a   :  { %v189_v26 = vmul.f32 %v939_v22, %v188_v24 }
 0x28c   :  { %v190_v28 = vadd.f32 %v939_v22, %v189_v26 }
 0x28e   :  { %v194_v30 = vsel %vm193_vm4, %v939_v22, %v190_v28  ;;  %v76_v22 = vld [vmem:[#allocation7 + $0x8] sm:$0xff] }
 0x28f   :  { %v199_v31 = vsel %vm196_vm5, %v198_v29, %v194_v30 }
 0x290   :  { %v214_v32 = vmul.f32 %v937_v17, %v199_v31 }
 0x292   :  { %889 = vmatmul.msk.f32.vlgmr.msrb.gmra.mxu1 %vm116_vm1, %v214_v32 }
 0x296   :  { %v143_v33 = vpop.permute.xlu1 %142 }
 0x297   :  { %887 = vmatpush.xpose.msk.msra.mxu2 %vm116_vm1, %v143_v33 }
 0x29a   :  { %888 = vmatmul.msk.f32.vlgmr.msra.gmra.mxu2 %vm116_vm1, %v1155_v20  ;;  %892 = vmatmul.msk.f32.vlgmr.msra.gmra.mxu1 %vm116_vm1, %v269_v34 }
 0x30f   :  { %v239_v36 = vpop.f32.mrf.mxu1 }
 0x310   :  { %899 = vmatmul.msk.f32.vlgmr.msrb.gmra.mxu0 %vm116_vm1, %v239_v36 }
 0x317   :  { %v293_v37 = vpop.f32.mrf.mxu1 }
 0x318   :  { %v324_v38 = vsel %vm116_vm1, %v293_v37, -inf }
 0x319   :  { %325 = vmax.xlane.f32.xlu1 %v324_v38 }
 0x31d   :  { %v165_v39 = vpop.f32.mrf.mxu2 }
 0x31e   :  { %v171_v40 = vsel %vm116_vm1, %v165_v39, -inf }
 0x31f   :  { %172 = vmax.xlane.f32.xlu2 %v171_v40 }
 0x332   :  { %296 = vrot.lane.b32.xlu1 %v1155_v20, %s1078_s12 }
 0x337   :  { %242 = vrot.lane.b32.xlu2 %v1155_v20, %s1075_s9 }
 0x33f   :  { %484 = vrot.lane.b32.xlu2 %v1139_v7, %s1079_s2 }
 0x38c   :  { %v326_v47 = vpop.xlane.xlu1 %325 }
 0x38d   :  { %v330_v48 = vsub.f32 %v293_v37, %v326_v47 }
 0x38f   :  { %v332_v49 = vmul.f32 1.442695, %v330_v48 }
 0x392   :  { %v173_v41 = vpop.xlane.xlu2 %172 }
 0x393   :  { %v175_v42 = vsub.f32 %v165_v39, %v173_v41 }
 0x395   :  { %v178_v43 = vmul.f32 1.442695, %v175_v42 }
 0x397   :  { %940 = vpow2.f32 %v178_v43 }
 0x398   :  { %942 = vpow2.f32 %v332_v49 }
 0x39a   :  { %v243_v44 = vpop.permute.xlu2 %242 }
 0x39b   :  { %263 = vmatpush.msra.mxu3 %v243_v44 }
 0x39d   :  { %v941_v45 = vpop.eup %940 }
 0x39e   :  { %v183_v46 = vsel %vm116_vm1, %v941_v45, 0.0  ;;  %v943_v50 = vpop.eup %942 }
 0x39f   :  { %184 = vadd.xlane.f32.xlu0 %v183_v46  ;;  %v336_v51 = vsel %vm116_vm1, %v943_v50, 0.0 }
 0x3a2   :  { %v485_v3 = vpop.permute.xlu2 %484 }
 0x3a4   :  { %v297_v1 = vpop.permute.xlu1 %296 }
 0x3b3   :  { %298 = vrot.lane.b32.xlu0 %v1155_v20, %s1077_s11 }
 0x3bb   :  { %372 = vrot.lane.b32.xlu0 %v1139_v7, %s1080_s13 }
 0x3e5   :  { %337 = vadd.xlane.f32.xlu0 %v336_v51 }
 0x3f9   :  { %482 = vrot.lane.b32.xlu0 %v1139_v7, %s1081_s14 }
 0x412   :  { %v185_v52 = vpop.xlane.xlu0 %184 }
 0x413   :  { %944 = vrcp.f32 %v185_v52  ;;  %v211_v56 = vand.u32 2147483648, %v185_v52  ;;  %v209_v58 = vand.u32 2147483647, %v185_v52  ;;  %vm205_vm7 = vweird.f32 %v185_v52 }
 0x415   :  { %v212_v60 = vor.u32 1.1754944e-38, %v211_v56  ;;  %vm210_vm9 = vcmp.eq.f32.partialorder %v209_v58, 8.507059e+37 }
 0x419   :  { %v945_v53 = vpop.eup %944 }
 0x41a   :  { %v201_v54 = vmul.f32 %v945_v53, %v185_v52  ;;  %vm206_vm6 = vweird.f32 %v945_v53 }
 0x41b   :  { %vm207_vm8 = vmor %vm205_vm7, %vm206_vm6 }
 0x41c   :  { %v202_v55 = vsub.f32 1.0, %v201_v54 }
 0x41e   :  { %v203_v57 = vmul.f32 %v945_v53, %v202_v55 }
 0x420   :  { %v204_v59 = vadd.f32 %v945_v53, %v203_v57 }
 0x422   :  { %v208_v61 = vsel %vm207_vm8, %v945_v53, %v204_v59 }
 0x423   :  { %v213_v62 = vsel %vm210_vm9, %v212_v60, %v208_v61 }
 0x424   :  { %v215_v63 = vmul.f32 %v941_v45, %v213_v62 }
 0x425   :  { %v299_v0 = vpop.permute.xlu0 %298 }
 0x426   :  { %890 = vmatmul.msk.f32.vlgmr.msra.gmra.mxu3 %vm116_vm1, %v215_v63  ;;  %893 = vmatpush.xpose.msk.msrb.mxu2 %vm116_vm1, %v299_v0 }
 0x429   :  { %894 = vmatmul.msk.f32.vlgmr.msrb.gmra.mxu2 %vm116_vm1, %v297_v1 }
 0x42a   :  { %445 = vmatpush.msra.mxu2 %v76_v22 }
 0x42d   :  { %v373_v2 = vpop.permute.xlu0 %372 }
 0x42e   :  { %393 = vmatpush.msrb.mxu3 %v373_v2 }
 0x430   :  { %901 = vmatpush.xpose.msk.msra.mxu3 %vm116_vm1, %v485_v3 }
 0x458   :  { %v338_v4 = vpop.xlane.xlu0 %337 }
 0x459   :  { %946 = vrcp.f32 %v338_v4  ;;  %v353_v9 = vand.u32 2147483648, %v338_v4  ;;  %v351_v11 = vand.u32 2147483647, %v338_v4  ;;  %vm347_vm11 = vweird.f32 %v338_v4 }
 0x45b   :  { %v354_v13 = vor.u32 1.1754944e-38, %v353_v9  ;;  %vm352_vm13 = vcmp.eq.f32.partialorder %v351_v11, 8.507059e+37 }
 0x45f   :  { %v947_v5 = vpop.eup %946 }
 0x460   :  { %v343_v6 = vmul.f32 %v947_v5, %v338_v4  ;;  %vm348_vm10 = vweird.f32 %v947_v5  ;;  %v1212_v4 = vpop.f32.mrf.mxu0 }
 0x461   :  { %vm349_vm12 = vmor %vm347_vm11, %vm348_vm10 }
 0x462   :  { %v344_v8 = vsub.f32 1.0, %v343_v6 }
 0x464   :  { %v345_v10 = vmul.f32 %v947_v5, %v344_v8 }
 0x466   :  { %v346_v12 = vadd.f32 %v947_v5, %v345_v10 }
 0x468   :  { %v350_v14 = vsel %vm349_vm12, %v947_v5, %v346_v12  ;;  %v77_v12 = vld [vmem:[#allocation7 + $0x10] sm:$0xff] }
 0x469   :  { %v355_v15 = vsel %vm352_vm13, %v354_v13, %v350_v14  ;;  %659 = vmatpush.msrb.mxu2 %v77_v12 }
 0x46a   :  { %v370_v16 = vmul.f32 %v943_v50, %v355_v15 }
 0x46b   :  { %v483_v17 = vpop.permute.xlu0 %482 }
 0x46c   :  { %895 = vmatmul.msk.f32.vlgmr.msrb.gmra.mxu3 %vm116_vm1, %v370_v16 }
 0x474   :  { %902 = vmatmul.msk.f32.vlgmr.msra.gmra.mxu3 %vm116_vm1, %v483_v17 }
 0x4a9   :  { %v265_v18 = vpop.f32.mrf.mxu3 }
 0x4aa   :  { %900 = vmatmul.msk.f32.gmra.mxu0 %vm116_vm1, %v265_v18 }
 0x4ac   :  { %v321_v19 = vpop.f32.mrf.mxu2 }
 0x4ad   :  { %v327_v21 = vsel %vm116_vm1, %v321_v19, -inf }
 0x4ae   :  { %328 = vmax.xlane.f32.xlu2 %v327_v21 }
 0x4c6   :  { %510 = vrot.lane.b32.xlu2 %v1155_v20, %s1081_s14 }
 0x4ef   :  { %v395_v23 = vpop.f32.mrf.mxu3 }
 0x4f0   :  { %897 = vmatmul.msk.f32.vlgmr.msra.gmra.mxu2 %vm116_vm1, %v395_v23 }
 0x4f7   :  { %v507_v24 = vpop.f32.mrf.mxu3 }
 0x4f8   :  { %v538_v25 = vsel %vm116_vm1, %v507_v24, -inf }
 0x4f9   :  { %539 = vmax.xlane.f32.xlu1 %v538_v25 }
 0x512   :  { %398 = vrot.lane.b32.xlu1 %v1155_v20, %s1080_s13 }
 0x51a   :  { %671 = vrot.lane.b32.xlu1 %v1139_v7, %s1082_s15 }
 0x521   :  { %v329_v26 = vpop.xlane.xlu2 %328 }
 0x522   :  { %v331_v27 = vsub.f32 %v321_v19, %v329_v26  ;;  %697 = vrot.lane.b32.xlu1 %v1155_v20, %s1083_s16 }
 0x524   :  { %v334_v28 = vmul.f32 1.442695, %v331_v27 }
 0x526   :  { %948 = vpow2.f32 %v334_v28 }
 0x527   :  { %v1215_v6 = vpop.f32.mrf.mxu0 }
 0x529   :  { %v511_v51 = vpop.permute.xlu2 %510 }
 0x52c   :  { %v949_v29 = vpop.eup %948 }
 0x52d   :  { %v339_v30 = vsel %vm116_vm1, %v949_v29, 0.0 }
 0x52e   :  { %340 = vadd.xlane.f32.xlu0 %v339_v30 }
 0x542   :  { %512 = vrot.lane.b32.xlu0 %v1155_v20, %s1079_s2 }
 0x54a   :  { %586 = vrot.lane.b32.xlu0 %v1139_v7, %s1084_s17 }
 0x552   :  { %669 = vrot.lane.b32.xlu0 %v1139_v7, %s1083_s16 }
 0x56c   :  { %v540_v31 = vpop.xlane.xlu1 %539 }
 0x56d   :  { %v544_v32 = vsub.f32 %v507_v24, %v540_v31 }
 0x56f   :  { %v546_v33 = vmul.f32 1.442695, %v544_v32 }
 0x571   :  { %950 = vpow2.f32 %v546_v33 }
 0x573   :  { %v447_v12 = vpop.f32.mrf.mxu2 }
 0x577   :  { %v951_v34 = vpop.eup %950 }
 0x578   :  { %v550_v35 = vsel %vm116_vm1, %v951_v34, 0.0 }
 0x579   :  { %551 = vadd.xlane.f32.xlu2 %v550_v35 }
 0x584   :  { %v399_v36 = vpop.permute.xlu1 %398 }
 0x585   :  { %419 = vmatpush.msrb.mxu1 %v399_v36 }
 0x58c   :  { %v672_v37 = vpop.permute.xlu1 %671 }
 0x58d   :  { %909 = vmatpush.xpose.msk.msra.mxu0 %vm116_vm1, %v672_v37 }
 0x591   :  { %699 = vrot.lane.b32.xlu2 %v1155_v20, %s1082_s15 }
 0x594   :  { %v698_v3 = vpop.permute.xlu1 %697 }
 0x5a1   :  { %v341_v38 = vpop.xlane.xlu0 %340 }
 0x5a2   :  { %952 = vrcp.f32 %v341_v38  ;;  %v367_v42 = vand.u32 2147483648, %v341_v38  ;;  %v365_v44 = vand.u32 2147483647, %v341_v38  ;;  %vm361_vm15 = vweird.f32 %v341_v38 }
 0x5a4   :  { %v368_v46 = vor.u32 1.1754944e-38, %v367_v42  ;;  %vm366_vm3 = vcmp.eq.f32.partialorder %v365_v44, 8.507059e+37 }
 0x5a8   :  { %v953_v39 = vpop.eup %952 }
 0x5a9   :  { %v357_v40 = vmul.f32 %v953_v39, %v341_v38  ;;  %vm362_vm14 = vweird.f32 %v953_v39 }
 0x5aa   :  { %vm363_vm2 = vmor %vm361_vm15, %vm362_vm14 }
 0x5ab   :  { %v358_v41 = vsub.f32 1.0, %v357_v40 }
 0x5ad   :  { %v359_v43 = vmul.f32 %v953_v39, %v358_v41 }
 0x5af   :  { %v360_v45 = vadd.f32 %v953_v39, %v359_v43 }
 0x5b1   :  { %v364_v47 = vsel %vm363_vm2, %v953_v39, %v360_v45 }
 0x5b2   :  { %v369_v48 = vsel %vm366_vm3, %v368_v46, %v364_v47 }
 0x5b3   :  { %v371_v49 = vmul.f32 %v949_v29, %v369_v48 }
 0x5b4   :  { %v513_v50 = vpop.permute.xlu0 %512 }
 0x5b5   :  { %896 = vmatmul.msk.f32.vlgmr.msrb.gmra.mxu1 %vm116_vm1, %v371_v49 }
 0x5b6   :  { %903 = vmatpush.xpose.msk.msra.mxu1 %vm116_vm1, %v513_v50 }
 0x5bc   :  { %v587_v52 = vpop.permute.xlu0 %586 }
 0x5bd   :  { %904 = vmatmul.msk.f32.vlgmr.msra.gmra.mxu1 %vm116_vm1, %v511_v51  ;;  %607 = vmatpush.msrb.mxu3 %v587_v52 }
 0x5c4   :  { %v670_v53 = vpop.permute.xlu0 %669 }
 0x5c5   :  { %910 = vmatmul.msk.f32.vlgmr.msra.gmra.mxu0 %vm116_vm1, %v670_v53 }
 0x5ec   :  { %v552_v54 = vpop.xlane.xlu2 %551 }
 0x5ed   :  { %954 = vrcp.f32 %v552_v54  ;;  %v567_v59 = vand.u32 2147483648, %v552_v54  ;;  %v565_v61 = vand.u32 2147483647, %v552_v54  ;;  %vm561_vm5 = vweird.f32 %v552_v54 }
 0x5ef   :  { %v568_v63 = vor.u32 1.1754944e-38, %v567_v59  ;;  %vm566_vm7 = vcmp.eq.f32.partialorder %v565_v61, 8.507059e+37 }
 0x5f3   :  { %v955_v55 = vpop.eup %954 }
 0x5f4   :  { %v557_v56 = vmul.f32 %v955_v55, %v552_v54  ;;  %v700_v57 = vpop.permute.xlu2 %699  ;;  %vm562_vm4 = vweird.f32 %v955_v55 }
 0x5f5   :  { %911 = vmatpush.xpose.msk.msra.mxu3 %vm116_vm1, %v700_v57  ;;  %vm563_vm6 = vmor %vm561_vm5, %vm562_vm4 }
 0x5f6   :  { %v558_v58 = vsub.f32 1.0, %v557_v56 }
 0x5f8   :  { %v559_v60 = vmul.f32 %v955_v55, %v558_v58 }
 0x5fa   :  { %v560_v62 = vadd.f32 %v955_v55, %v559_v60 }
 0x5fc   :  { %v564_v0 = vsel %vm563_vm6, %v955_v55, %v560_v62 }
 0x5fd   :  { %v569_v1 = vsel %vm566_vm7, %v568_v63, %v564_v0 }
 0x5fe   :  { %v584_v2 = vmul.f32 %v951_v34, %v569_v1 }
 0x600   :  { %905 = vmatmul.msk.f32.vlgmr.msrb.gmra.mxu3 %vm116_vm1, %v584_v2 }
 0x608   :  { %912 = vmatmul.msk.f32.vlgmr.msra.gmra.mxu3 %vm116_vm1, %v698_v3 }
 0x632   :  { %v421_v5 = vpop.f32.mrf.mxu1 }
 0x633   :  { %898 = vmatmul.msk.f32.gmra.mxu2 %vm116_vm1, %v421_v5 }
 0x63a   :  { %v535_v8 = vpop.f32.mrf.mxu1 }
 0x63b   :  { %v541_v9 = vsel %vm116_vm1, %v535_v8, -inf }
 0x63c   :  { %542 = vmax.xlane.f32.xlu2 %v541_v9 }
 0x642   :  { %v694_v10 = vpop.f32.mrf.mxu0 }
 0x643   :  { %v725_v11 = vsel %vm116_vm1, %v694_v10, -inf }
 0x644   :  { %726 = vmax.xlane.f32.xlu0 %v725_v11 }
 0x683   :  { %v609_v13 = vpop.f32.mrf.mxu3 }
 0x684   :  { %907 = vmatmul.msk.f32.vlgmr.msrb.gmra.mxu2 %vm116_vm1, %v609_v13 }
 0x68b   :  { %v722_v14 = vpop.f32.mrf.mxu3 }
 0x68c   :  { %v728_v15 = vsel %vm116_vm1, %v722_v14, -inf }
 0x68d   :  { %729 = vmax.xlane.f32.xlu1 %v728_v15  ;;  %v477_v15 = vadd.f32 %v1212_v4, %v447_v12 }
 0x6af   :  { %v543_v16 = vpop.xlane.xlu2 %542 }
 0x6b0   :  { %v545_v17 = vsub.f32 %v535_v8, %v543_v16  ;;  %v78_v8 = vld [vmem:[#allocation7 + $0x18] sm:$0xff] }
 0x6b1   :  { %846 = vmatpush.msrb.mxu3 %v78_v8 }
 0x6b2   :  { %v548_v18 = vmul.f32 1.442695, %v545_v17  ;;  %v935_v17 = vld [vmem:[%s1251_s4] ss:$0 sm:$0xff] }
 0x6b4   :  { %956 = vpow2.f32 %v548_v18 }
 0x6b6   :  { %v450_v13 = vpop.f32.mrf.mxu2 }
 0x6b7   :  { %v727_v19 = vpop.xlane.xlu0 %726 }
 0x6b8   :  { %v731_v21 = vsub.f32 %v694_v10, %v727_v19 }
 0x6ba   :  { %v957_v22 = vpop.eup %956  ;;  %v733_v23 = vmul.f32 1.442695, %v731_v21 }
 0x6bb   :  { %v553_v24 = vsel %vm116_vm1, %v957_v22, 0.0 }
 0x6bc   :  { %958 = vpow2.f32 %v733_v23  ;;  %554 = vadd.xlane.f32.xlu2 %v553_v24  ;;  %v480_v23 = vadd.f32 %v1215_v6, %v450_v13 }
 0x6c2   :  { %v959_v25 = vpop.eup %958 }
 0x6c3   :  { %v737_v26 = vsel %vm116_vm1, %v959_v25, 0.0 }
 0x6c4   :  { %738 = vadd.xlane.f32.xlu0 %v737_v26 }
 0x6d4   :  { %612 = vrot.lane.b32.xlu2 %v1155_v20, %s1084_s17 }
 0x6d8   :  { %773 = vrot.lane.b32.xlu0 %v1139_v7, %s1085_s18 }
 0x700   :  { %v730_v27 = vpop.xlane.xlu1 %729 }
 0x701   :  { %v732_v28 = vsub.f32 %v722_v14, %v730_v27 }
 0x703   :  { %v735_v29 = vmul.f32 1.442695, %v732_v28 }
 0x705   :  { %960 = vpow2.f32 %v735_v29 }
 0x707   :  { %v661_v14 = vpop.f32.mrf.mxu2 }
 0x708   :  { %v667_v16 = vadd.f32 %v661_v14, %v477_v15 }
 0x70b   :  { %v961_v30 = vpop.eup %960 }
 0x70c   :  { %v740_v31 = vsel %vm116_vm1, %v961_v30, 0.0 }
 0x70d   :  { %741 = vadd.xlane.f32.xlu1 %v740_v31 }
 0x726   :  { %799 = vrot.lane.b32.xlu1 %v1155_v20, %s1085_s18 }
 0x72f   :  { %v555_v32 = vpop.xlane.xlu2 %554 }
 0x730   :  { %962 = vrcp.f32 %v555_v32  ;;  %v581_v7 = vand.u32 2147483648, %v555_v32  ;;  %v579_v39 = vand.u32 2147483647, %v555_v32  ;;  %vm575_vm9 = vweird.f32 %v555_v32 }
 0x732   :  { %v582_v42 = vor.u32 1.1754944e-38, %v581_v7  ;;  %vm580_vm11 = vcmp.eq.f32.partialorder %v579_v39, 8.507059e+37 }
 0x736   :  { %v963_v33 = vpop.eup %962 }
 0x737   :  { %v571_v34 = vmul.f32 %v963_v33, %v555_v32  ;;  %v613_v35 = vpop.permute.xlu2 %612  ;;  %v739_v36 = vpop.xlane.xlu0 %738  ;;  %vm576_vm8 = vweird.f32 %v963_v33 }
 0x738   :  { %964 = vrcp.f32 %v739_v36  ;;  %633 = vmatpush.msrb.mxu1 %v613_v35  ;;  %vm577_vm10 = vmor %vm575_vm9, %vm576_vm8  ;;  %v754_v47 = vand.u32 2147483648, %v739_v36  ;;  %v752_v49 = vand.u32 2147483647, %v739_v36  ;;  %vm748_vm13 = vweird.f32 %v739_v36 }
 0x739   :  { %v572_v37 = vsub.f32 1.0, %v571_v34 }
 0x73a   :  { %v755_v51 = vor.u32 1.1754944e-38, %v754_v47  ;;  %vm753_vm15 = vcmp.eq.f32.partialorder %v752_v49, 8.507059e+37 }
 0x73b   :  { %v573_v38 = vmul.f32 %v963_v33, %v572_v37 }
 0x73d   :  { %v574_v40 = vadd.f32 %v963_v33, %v573_v38 }
 0x73e   :  { %v965_v41 = vpop.eup %964 }
 0x73f   :  { %v578_v43 = vsel %vm577_vm10, %v963_v33, %v574_v40  ;;  %v744_v20 = vmul.f32 %v965_v41, %v739_v36  ;;  %vm749_vm12 = vweird.f32 %v965_v41 }
 0x740   :  { %v583_v44 = vsel %vm580_vm11, %v582_v42, %v578_v43  ;;  %vm750_vm14 = vmor %vm748_vm13, %vm749_vm12 }
 0x741   :  { %v745_v45 = vsub.f32 1.0, %v744_v20  ;;  %v585_v46 = vmul.f32 %v957_v22, %v583_v44 }
 0x743   :  { %v746_v48 = vmul.f32 %v965_v41, %v745_v45  ;;  %906 = vmatmul.msk.f32.vlgmr.msrb.gmra.mxu1 %vm116_vm1, %v585_v46 }
 0x745   :  { %v747_v50 = vadd.f32 %v965_v41, %v746_v48 }
 0x747   :  { %v751_v52 = vsel %vm750_vm14, %v965_v41, %v747_v50 }
 0x748   :  { %v756_v53 = vsel %vm753_vm15, %v755_v51, %v751_v52 }
 0x749   :  { %v771_v54 = vmul.f32 %v959_v25, %v756_v53 }
 0x74a   :  { %v774_v55 = vpop.permute.xlu0 %773 }
 0x74b   :  { %794 = vmatpush.msra.mxu1 %v774_v55 }
 0x74c   :  { %913 = vmatmul.msk.f32.vlgmr.msra.gmra.mxu1 %vm116_vm1, %v771_v54 }
 0x780   :  { %v742_v56 = vpop.xlane.xlu1 %741 }
 0x781   :  { %966 = vrcp.f32 %v742_v56  ;;  %v768_v62 = vand.u32 2147483648, %v742_v56  ;;  %vm762_vm3 = vweird.f32 %v742_v56  ;;  %v766_v63 = vand.u32 2147483647, %v742_v56 }
 0x783   :  { %v769_v1 = vor.u32 1.1754944e-38, %v768_v62  ;;  %vm767_vm5 = vcmp.eq.f32.partialorder %v766_v63, 8.507059e+37 }
 0x787   :  { %v967_v57 = vpop.eup %966 }
 0x788   :  { %v758_v58 = vmul.f32 %v967_v57, %v742_v56  ;;  %vm763_vm2 = vweird.f32 %v967_v57 }
 0x789   :  { %vm764_vm4 = vmor %vm762_vm3, %vm763_vm2 }
 0x78a   :  { %v759_v59 = vsub.f32 1.0, %v758_v58 }
 0x78c   :  { %v760_v60 = vmul.f32 %v967_v57, %v759_v59 }
 0x78e   :  { %v761_v61 = vadd.f32 %v967_v57, %v760_v60 }
 0x790   :  { %v765_v0 = vsel %vm764_vm4, %v967_v57, %v761_v61 }
 0x791   :  { %v770_v2 = vsel %vm767_vm5, %v769_v1, %v765_v0 }
 0x792   :  { %v772_v5 = vmul.f32 %v961_v30, %v770_v2 }
 0x798   :  { %v800_v3 = vpop.permute.xlu1 %799 }
 0x799   :  { %820 = vmatpush.msrb.mxu0 %v800_v3 }
 0x79a   :  { %914 = vmatmul.msk.f32.vlgmr.msrb.gmra.mxu0 %vm116_vm1, %v772_v5 }
 0x7c0   :  { %v635_v9 = vpop.f32.mrf.mxu1 }
 0x7c1   :  { %908 = vmatmul.msk.f32.gmra.mxu2 %vm116_vm1, %v635_v9 }
 0x7c9   :  { %v796_v10 = vpop.f32.mrf.mxu1 }
 0x7ca   :  { %915 = vmatmul.msk.f32.vlgmr.msrb.gmra.mxu3 %vm116_vm1, %v796_v10 }
 0x817   :  { %v822_v11 = vpop.f32.mrf.mxu0 }
 0x818   :  { %916 = vmatmul.msk.f32.gmra.mxu3 %vm116_vm1, %v822_v11 }
 0x844   :  { %v664_v22 = vpop.f32.mrf.mxu2 }
 0x845   :  { %v668_v24 = vadd.f32 %v664_v22, %v480_v23 }
 0x84d   :  { %v848_v18 = vpop.f32.mrf.mxu3 }
 0x84e   :  { %v854_v19 = vadd.f32 %v848_v18, %v667_v16 }
 0x850   :  { %v859_v21 = vadd.f32 %v935_v17, %v854_v19 }
 0x852   :  { %861 = vst.msk [vmem:[#allocation8] sm:$0xff] %vm83_vm0, %v859_v21 }
 0x89b   :  { %v851_v25 = vpop.f32.mrf.mxu3 }
 0x89c   :  { %v855_v4 = vadd.f32 %v851_v25, %v668_v24 }
 0x89e   :  { %v860_v26 = vadd.f32 %v935_v17, %v855_v4 }
 0x8a0   :  { %862 = vst.msk [vmem:[#allocation8 + $0x8] sm:$0xff] %vm83_vm0, %v860_v26 }
 0x8a1   :  { %875 = dma.vmem_to_hbm [thread:$0]  %s868_s22, 256, %s870_s25, [#allocation4], %s1071_s26, %s1071_s26, %s1072_s27  }
 0x8a2   :  { %1068 = dma.done.wait [#allocation4], 256  }
 0x8a3   :  { %1069 = vsyncadd [#allocation4], 4294967040 }
 0x8a4   :  { %880 = vsyncpa [#allocation3], 1 }
 0x8a5   :  { %881 = vsyncpa [#allocation6], 1 }
 0x8a6   :  { %882 = vsyncpa [#allocation4], 1 }

</bundles_post_ra>
